<compile_context>
chip_gen: v7x
topology: tpu7x:2x2x1
jax: 0.10.0
libtpu: 0.0.40
codegen_flags: <defaults>
</compile_context>

<pallas_src>
import jax
import jax.numpy as jnp
from jax.experimental import pallas as pl
from jax.experimental.pallas import tpu as pltpu


# --------------------------------------------------------------------------- #
# Fully fused single-pass kernel: whole (T, hid) activation resident in VMEM.  #
# --------------------------------------------------------------------------- #
def _fused_kernel(t_len, hid_ch, n_taps, dilation, mm_dtype, eps):
    f32 = jnp.float32

    def kernel(x_ref, win_ref, bin_ref, a1_ref, g1_ref, be1_ref,
               wd_ref, bd_ref, a2_ref, g2_ref, be2_ref, wcat_ref, bcat_ref,
               out_ref, buf_ref):
        inv_n = 1.0 / float(t_len * hid_ch)

        # block_in (1x1 conv == matmul) + PReLU1
        y = jnp.dot(x_ref[0], win_ref[...], preferred_element_type=f32)
        y = y + bin_ref[...]
        a1 = a1_ref[0]                                            # SMEM scalar
        y = jnp.where(y >= 0, y, a1 * y)                          # (T, hid) f32

        # GroupNorm(1, hid): one-pass stats over the whole (T, hid) slab.
        mean1 = jnp.sum(y, keepdims=True) * inv_n                 # (1, 1)
        var1 = jnp.sum(y * y, keepdims=True) * inv_n - mean1 * mean1
        rstd1 = jax.lax.rsqrt(var1 + eps)
        s1 = rstd1 * g1_ref[...]                                  # (1, hid)
        t1 = be1_ref[...] - mean1 * rstd1 * g1_ref[...]

        # Zero-padded scratch for the dilated depthwise conv; only the
        # 2*dilation pad rows are zero-filled.
        buf_ref[0:dilation, :] = jnp.zeros((dilation, hid_ch), f32)
        buf_ref[dilation:dilation + t_len, :] = y * s1 + t1
        buf_ref[t_len + dilation:t_len + 2 * dilation, :] = jnp.zeros(
            (dilation, hid_ch), f32)

        # Depthwise dilated conv (groups == hid_ch), taps at offsets k*dilation.
        acc = jnp.zeros((t_len, hid_ch), f32)
        for k in range(n_taps):                                   # static unroll
            acc = acc + wd_ref[k:k + 1, :] * buf_ref[k * dilation:k * dilation + t_len, :]
        acc = acc + bd_ref[...]
        a2 = a2_ref[0]
        y2 = jnp.where(acc >= 0, acc, a2 * acc)

        # GroupNorm2 (full stats available here) + fused [resid || skip] matmul.
        mean2 = jnp.sum(y2, keepdims=True) * inv_n
        var2 = jnp.sum(y2 * y2, keepdims=True) * inv_n - mean2 * mean2
        rstd2 = jax.lax.rsqrt(var2 + eps)
        z2 = y2 * (rstd2 * g2_ref[...]) + (be2_ref[...] - mean2 * rstd2 * g2_ref[...])

        out_ref[0] = (jnp.dot(z2.astype(mm_dtype), wcat_ref[...],
                              preferred_element_type=f32) + bcat_ref[...])

    return kernel


# --------------------------------------------------------------------------- #
# Tiled two-stage path (fallback for very long T or tiny VMEM).                #
# --------------------------------------------------------------------------- #
def _stage1_kernel(tile_t, hid_ch, dilation):
    """block_in + PReLU1, stash y1 + halo edge slabs + GroupNorm1 partials."""

    def kernel(x_ref, win_ref, bin_ref, a1_ref,
               y1_ref, hlo_ref, hhi_ref, ps_ref, pss_ref):
        x = x_ref[0]                                              # (tile_t, io)
        y = jnp.dot(x, win_ref[...], preferred_element_type=jnp.float32)
        y = y + bin_ref[...]
        a1 = a1_ref[0]                                            # SMEM scalar
        y = jnp.where(y >= 0, y, a1 * y)
        y1_ref[0] = y.astype(y1_ref.dtype)
        # halo edge slabs for the neighbouring tiles' depthwise conv
        hlo_ref[0, 0] = y[0:dilation, :].astype(hlo_ref.dtype)
        hhi_ref[0, 0] = y[tile_t - dilation:tile_t, :].astype(hhi_ref.dtype)
        ps_ref[...] = jnp.sum(y, axis=0, keepdims=True).reshape(1, 1, 1, hid_ch)
        pss_ref[...] = jnp.sum(y * y, axis=0, keepdims=True).reshape(1, 1, 1, hid_ch)

    return kernel


def _stage2_kernel(tile_t, hid_ch, n_taps, dilation, mm_dtype):
    """GroupNorm1 apply + dilated depthwise conv (tiny halo slabs) + PReLU2 +
    GroupNorm2 partials + fused (resid||skip) matmul (gamma2 pre-folded)."""
    f32 = jnp.float32

    def kernel(cur_ref, phi_ref, nlo_ref, s1_ref, t1_ref, wd_ref, bd_ref,
               a2_ref, wcat_ref, raw_ref, ps_ref, pss_ref, buf_ref):
        i = pl.program_id(1)
        last = pl.num_programs(1) - 1
        s1 = s1_ref[0]                                            # (1, hid)
        t1 = t1_ref[0]
        lgate = (i > 0).astype(f32)                               # 0 at seq start
        rgate = (i < last).astype(f32)                            # 0 at seq end

        # Scratch layout: [left halo | z | right halo]; only the 2*dilation
        # halo rows beyond z are written (no full zero fill).
        buf_ref[0:dilation, :] = lgate * (phi_ref[0, 0].astype(f32) * s1 + t1)
        buf_ref[dilation:dilation + tile_t, :] = cur_ref[0].astype(f32) * s1 + t1
        buf_ref[tile_t + dilation:tile_t + 2 * dilation, :] = (
            rgate * (nlo_ref[0, 0].astype(f32) * s1 + t1))

        acc = jnp.zeros((tile_t, hid_ch), f32)
        for k in range(n_taps):                                   # static unroll
            acc = acc + wd_ref[k:k + 1, :] * buf_ref[k * dilation:k * dilation + tile_t, :]
        acc = acc + bd_ref[...]
        a2 = a2_ref[0]
        y2 = jnp.where(acc >= 0, acc, a2 * acc)

        ps_ref[...] = jnp.sum(y2, axis=0, keepdims=True).reshape(1, 1, 1, hid_ch)
        pss_ref[...] = jnp.sum(y2 * y2, axis=0, keepdims=True).reshape(1, 1, 1, hid_ch)

        raw_ref[0] = jnp.dot(y2.astype(mm_dtype), wcat_ref[...],
                             preferred_element_type=f32)

    return kernel


def conv_block_pallas(x_ncl, params, *, kernel=3, dil_iter=0, send_resid=True,
                      eps=1e-8, tile_t=None, compute_dtype=jnp.bfloat16,
                      fuse="auto"):
    """ConvBlock forward.  x_ncl: (B, io_ch, T) f32 (PyTorch Conv1d layout).
    Returns (resid, skip) in the same layout."""
    B, io_ch, T = x_ncl.shape
    hid_ch = params["w_in"].shape[0]
    dilation = 2 ** dil_iter
    # padding == dilation gives a "same"-length output only for kernel == 3,
    # which is what ConvTasNet uses (and what the halo logic assumes).
    assert kernel == 3, "ConvBlock Pallas kernel assumes kernel == 3"
    assert dilation < T

    f32 = jnp.float32
    mm_dtype = compute_dtype

    # ---- parameter prep (plain-JAX glue; channel-last, matmul-ready) ---------
    x_btc = jnp.transpose(x_ncl, (0, 2, 1)).astype(mm_dtype)               # (B, T, io)
    win = jnp.transpose(params["w_in"][:, :, 0], (1, 0)).astype(mm_dtype)  # (io, hid)
    bin_ = params["b_in"].reshape(1, hid_ch).astype(f32)
    a1 = params["a1"].reshape(1).astype(f32)
    a2 = params["a2"].reshape(1).astype(f32)
    g1 = params["g1"].astype(f32)
    be1 = params["be1"].astype(f32)
    g2 = params["g2"].astype(f32)
    be2 = params["be2"].astype(f32)
    wd = jnp.transpose(params["w_d"][:, 0, :], (1, 0)).astype(f32)         # (kernel, hid)
    bd = params["b_d"].reshape(1, hid_ch).astype(f32)

    wo = jnp.transpose(params["w_out"][:, :, 0], (1, 0)).astype(f32)       # (hid, io)
    ws = jnp.transpose(params["w_skip"][:, :, 0], (1, 0)).astype(f32)
    bo = params["b_out"].astype(f32)
    bs = params["b_skip"].astype(f32)
    if send_resid:
        wcat = jnp.concatenate([wo, ws], axis=1)                           # (hid, 2*io)
        bcat = jnp.concatenate([bo, bs], axis=0)
    else:                      # resid not needed: drop its matmul + writeback
        wcat, bcat = ws, bs
    ncols = wcat.shape[1]

    # ---- path selection -------------------------------------------------------
    act_bytes = T * hid_ch * 4                     # one f32 (T, hid) activation
    if fuse == "auto":
        # fused path keeps ~6-8 live (T, hid) f32 slabs in VMEM; 5 MiB / slab is
        # comfortably inside a 48 MiB scoped limit even on v7x (64 MiB VMEM).
        use_fused = (tile_t is None) and (act_bytes <= 5 * 1024 * 1024)
    else:
        use_fused = bool(fuse)

    if use_fused:
        out_btc = pl.pallas_call(
            _fused_kernel(T, hid_ch, kernel, dilation, mm_dtype, eps),
            out_shape=jax.ShapeDtypeStruct((B, T, ncols), f32),
            grid=(B,),
            in_specs=[
                pl.BlockSpec((1, T, io_ch), lambda b: (b, 0, 0)),          # x
                pl.BlockSpec((io_ch, hid_ch), lambda b: (0, 0)),           # W_in
                pl.BlockSpec((1, hid_ch), lambda b: (0, 0)),               # b_in
                pl.BlockSpec(memory_space=pltpu.MemorySpace.SMEM),         # a1
                pl.BlockSpec((1, hid_ch), lambda b: (0, 0)),               # gamma1
                pl.BlockSpec((1, hid_ch), lambda b: (0, 0)),               # beta1
                pl.BlockSpec((kernel, hid_ch), lambda b: (0, 0)),          # W_depth
                pl.BlockSpec((1, hid_ch), lambda b: (0, 0)),               # b_depth
                pl.BlockSpec(memory_space=pltpu.MemorySpace.SMEM),         # a2
                pl.BlockSpec((1, hid_ch), lambda b: (0, 0)),               # gamma2
                pl.BlockSpec((1, hid_ch), lambda b: (0, 0)),               # beta2
                pl.BlockSpec((hid_ch, ncols), lambda b: (0, 0)),           # [Wout||Wskip]
                pl.BlockSpec((1, ncols), lambda b: (0, 0)),                # [bout||bskip]
            ],
            out_specs=pl.BlockSpec((1, T, ncols), lambda b: (b, 0, 0)),
            scratch_shapes=[pltpu.VMEM((T + 2 * dilation, hid_ch), f32)],
            compiler_params=pltpu.CompilerParams(
                dimension_semantics=("parallel",),
                vmem_limit_bytes=48 * 1024 * 1024,
            ),
        )(x_btc, win, bin_, a1,
          g1.reshape(1, hid_ch), be1.reshape(1, hid_ch), wd, bd, a2,
          g2.reshape(1, hid_ch), be2.reshape(1, hid_ch),
          wcat.astype(mm_dtype), bcat.reshape(1, ncols))
    else:
        # ---- T tiling ---------------------------------------------------------
        if tile_t is None:
            tile_t = min(T, 512)   # halve for very large hid_ch on v7x (64 MiB VMEM)
        tile_t = min(tile_t, T)
        if (T % tile_t != 0) or (dilation > tile_t) or (tile_t % 8 != 0 and tile_t != T):
            tile_t = T             # fall back to one whole-T tile (still correct)
        n_t = T // tile_t
        n_elems = T * hid_ch

        cparams = pltpu.CompilerParams(
            dimension_semantics=("parallel", "parallel"),
            vmem_limit_bytes=32 * 1024 * 1024,
        )

        # ---- stage 1: block_in + PReLU1 + halo slabs + GroupNorm1 partials -----
        y1, hlo, hhi, ps1, pss1 = pl.pallas_call(
            _stage1_kernel(tile_t, hid_ch, dilation),
            out_shape=(
                jax.ShapeDtypeStruct((B, T, hid_ch), mm_dtype),
                jax.ShapeDtypeStruct((B, n_t, dilation, hid_ch), mm_dtype),
                jax.ShapeDtypeStruct((B, n_t, dilation, hid_ch), mm_dtype),
                jax.ShapeDtypeStruct((B, n_t, 1, hid_ch), f32),
                jax.ShapeDtypeStruct((B, n_t, 1, hid_ch), f32),
            ),
            grid=(B, n_t),
            in_specs=[
                pl.BlockSpec((1, tile_t, io_ch), lambda b, i: (b, i, 0)),
                pl.BlockSpec((io_ch, hid_ch), lambda b, i: (0, 0)),
                pl.BlockSpec((1, hid_ch), lambda b, i: (0, 0)),
                pl.BlockSpec(memory_space=pltpu.MemorySpace.SMEM),           # a1
            ],
            out_specs=(
                pl.BlockSpec((1, tile_t, hid_ch), lambda b, i: (b, i, 0)),
                pl.BlockSpec((1, 1, dilation, hid_ch), lambda b, i: (b, i, 0, 0)),
                pl.BlockSpec((1, 1, dilation, hid_ch), lambda b, i: (b, i, 0, 0)),
                pl.BlockSpec((1, 1, 1, hid_ch), lambda b, i: (b, i, 0, 0)),
                pl.BlockSpec((1, 1, 1, hid_ch), lambda b, i: (b, i, 0, 0)),
            ),
            compiler_params=cparams,
        )(x_btc, win, bin_, a1)

        # Finish GroupNorm1 stats (one pass: var = E[y^2] - mean^2).
        sum1 = jnp.sum(ps1, axis=(1, 2, 3))
        sumsq1 = jnp.sum(pss1, axis=(1, 2, 3))
        mean1 = sum1 / n_elems
        var1 = sumsq1 / n_elems - mean1 * mean1
        rstd1 = jax.lax.rsqrt(var1 + eps)
        s1 = (rstd1[:, None] * g1[None, :]).reshape(B, 1, hid_ch)
        t1 = (be1[None, :] - mean1[:, None] * rstd1[:, None] * g1[None, :]
              ).reshape(B, 1, hid_ch)

        wcat_mm = (g2[:, None] * wcat).astype(mm_dtype)    # fold GroupNorm2 gamma

        # ---- stage 2: norm1-apply + depthwise + PReLU2 + fused output matmul ---
        raw, ps2, pss2 = pl.pallas_call(
            _stage2_kernel(tile_t, hid_ch, kernel, dilation, mm_dtype),
            out_shape=(
                jax.ShapeDtypeStruct((B, T, ncols), f32),
                jax.ShapeDtypeStruct((B, n_t, 1, hid_ch), f32),
                jax.ShapeDtypeStruct((B, n_t, 1, hid_ch), f32),
            ),
            grid=(B, n_t),
            in_specs=[
                pl.BlockSpec((1, tile_t, hid_ch), lambda b, i: (b, i, 0)),       # cur
                pl.BlockSpec((1, 1, dilation, hid_ch),                            # prev halo
                             lambda b, i: (b, jnp.maximum(i - 1, 0), 0, 0)),
                pl.BlockSpec((1, 1, dilation, hid_ch),                            # next halo
                             lambda b, i: (b, jnp.minimum(i + 1, n_t - 1), 0, 0)),
                pl.BlockSpec((1, 1, hid_ch), lambda b, i: (b, 0, 0)),             # scale1
                pl.BlockSpec((1, 1, hid_ch), lambda b, i: (b, 0, 0)),             # shift1
                pl.BlockSpec((kernel, hid_ch), lambda b, i: (0, 0)),              # depthwise W
                pl.BlockSpec((1, hid_ch), lambda b, i: (0, 0)),                   # depthwise b
                pl.BlockSpec(memory_space=pltpu.MemorySpace.SMEM),                # a2
                pl.BlockSpec((hid_ch, ncols), lambda b, i: (0, 0)),               # fused W
            ],
            out_specs=(
                pl.BlockSpec((1, tile_t, ncols), lambda b, i: (b, i, 0)),
                pl.BlockSpec((1, 1, 1, hid_ch), lambda b, i: (b, i, 0, 0)),
                pl.BlockSpec((1, 1, 1, hid_ch), lambda b, i: (b, i, 0, 0)),
            ),
            scratch_shapes=[pltpu.VMEM((tile_t + 2 * dilation, hid_ch), f32)],
            compiler_params=cparams,
        )(y1, hhi, hlo, s1, t1, wd, bd, a2, wcat_mm)

        # Finish GroupNorm2 stats; remaining per-batch affine fuses with the
        # transpose back to (B, C, T) in XLA.
        sum2 = jnp.sum(ps2, axis=(1, 2, 3))
        sumsq2 = jnp.sum(pss2, axis=(1, 2, 3))
        mean2 = sum2 / n_elems
        var2 = sumsq2 / n_elems - mean2 * mean2
        rstd2 = jax.lax.rsqrt(var2 + eps)
        gw = jnp.dot(g2, wcat, precision="highest")                 # (ncols,)
        bw = jnp.dot(be2, wcat, precision="highest")
        c2 = (bw + bcat)[None, :] - (mean2 * rstd2)[:, None] * gw[None, :]
        out_btc = raw * rstd2[:, None, None] + c2[:, None, :]       # (B, T, ncols)

    out_nct = jnp.transpose(out_btc, (0, 2, 1))                     # (B, ncols, T)
    if send_resid:
        resid = out_nct[:, :io_ch, :]
        skip = out_nct[:, io_ch:, :]
    else:
        skip = out_nct
        resid = jnp.zeros_like(skip)
    return resid, skip


def conv_block_ref(x, p, *, kernel=3, dil_iter=0, send_resid=True, eps=1e-8):
    """Pure-JAX f32 reference mirroring the PyTorch forward (NCL layout)."""
    dil = 2 ** dil_iter
    T = x.shape[-1]
    hp = "highest"
    y = jnp.einsum("hc,bct->bht", p["w_in"][:, :, 0], x, precision=hp) + p["b_in"][None, :, None]
    y = jnp.where(y >= 0, y, p["a1"][0] * y)
    mean = jnp.mean(y, axis=(1, 2), keepdims=True)
    var = jnp.mean((y - mean) ** 2, axis=(1, 2), keepdims=True)
    y = (y - mean) * jax.lax.rsqrt(var + eps) * p["g1"][None, :, None] + p["be1"][None, :, None]
    xp = jnp.pad(y, ((0, 0), (0, 0), (dil, dil)))
    acc = jnp.zeros_like(y)
    for k in range(kernel):
        acc = acc + p["w_d"][None, :, 0, k:k + 1] * xp[:, :, k * dil:k * dil + T]
    y = acc + p["b_d"][None, :, None]
    y = jnp.where(y >= 0, y, p["a2"][0] * y)
    mean = jnp.mean(y, axis=(1, 2), keepdims=True)
    var = jnp.mean((y - mean) ** 2, axis=(1, 2), keepdims=True)
    y = (y - mean) * jax.lax.rsqrt(var + eps) * p["g2"][None, :, None] + p["be2"][None, :, None]
    resid = jnp.einsum("oh,bht->bot", p["w_out"][:, :, 0], y, precision=hp) + p["b_out"][None, :, None]
    skip = jnp.einsum("oh,bht->bot", p["w_skip"][:, :, 0], y, precision=hp) + p["b_skip"][None, :, None]
    if not send_resid:
        resid = jnp.zeros_like(resid)
    return resid, skip


if __name__ == "__main__":
    # Small synthetic config: io_ch=4, hid_ch=32, T=16, B=2, kernel=3.
    B, IO_CH, HID_CH, T = 2, 4, 32, 16
    KERNEL = 3

    key = jax.random.PRNGKey(0)
    keys = jax.random.split(key, 16)
    params = {
        "w_in": 0.1 * jax.random.normal(keys[0], (HID_CH, IO_CH, 1), jnp.float32),
        "b_in": 0.1 * jax.random.normal(keys[1], (HID_CH,), jnp.float32),
        "a1": jnp.full((1,), 0.25, jnp.float32),                 # PReLU default init
        "g1": 1.0 + 0.1 * jax.random.normal(keys[2], (HID_CH,), jnp.float32),
        "be1": 0.1 * jax.random.normal(keys[3], (HID_CH,), jnp.float32),
        "w_d": 0.1 * jax.random.normal(keys[4], (HID_CH, 1, KERNEL), jnp.float32),
        "b_d": 0.1 * jax.random.normal(keys[5], (HID_CH,), jnp.float32),
        "a2": jnp.full((1,), 0.25, jnp.float32),
        "g2": 1.0 + 0.1 * jax.random.normal(keys[6], (HID_CH,), jnp.float32),
        "be2": 0.1 * jax.random.normal(keys[7], (HID_CH,), jnp.float32),
        "w_out": 0.1 * jax.random.normal(keys[8], (IO_CH, HID_CH, 1), jnp.float32),
        "b_out": 0.1 * jax.random.normal(keys[9], (IO_CH,), jnp.float32),
        "w_skip": 0.1 * jax.random.normal(keys[10], (IO_CH, HID_CH, 1), jnp.float32),
        "b_skip": 0.1 * jax.random.normal(keys[11], (IO_CH,), jnp.float32),
    }
    x = jax.random.normal(keys[12], (B, IO_CH, T), jnp.float32)

    # (dil_iter, send_resid, tile_t, matmul dtype): exercises the multi-tile
    # halo path, the no-resid path, the single-tile tiled path, and both fused
    # (bf16 / f32, resid / no-resid) paths.
    configs = [
        (1, True, 8, jnp.float32),       # tiled, 2 T-tiles, halo slabs, f32
        (2, False, 8, jnp.float32),      # tiled, no-resid (skip-only matmul)
        (0, True, 16, jnp.bfloat16),     # tiled, single whole-T tile, bf16 stash
        (1, True, None, jnp.bfloat16),   # fused single-pass, bf16 matmuls
        (3, False, None, jnp.float32),   # fused single-pass, no-resid, dil=8
    ]
    for dil_iter, send_resid, tt, cdt in configs:
        resid, skip = jax.block_until_ready(
            conv_block_pallas(x, params, kernel=KERNEL, dil_iter=dil_iter,
                              send_resid=send_resid, tile_t=tt,
                              compute_dtype=cdt))
        r_ref, s_ref = conv_block_ref(x, params, kernel=KERNEL, dil_iter=dil_iter,
                                      send_resid=send_resid)
        tol = 5e-2 if cdt == jnp.bfloat16 else 1e-2
        assert jnp.allclose(resid, r_ref, rtol=tol, atol=tol), (
            f"resid mismatch: dil_iter={dil_iter} send_resid={send_resid} tile={tt}")
        assert jnp.allclose(skip, s_ref, rtol=tol, atol=tol), (
            f"skip mismatch: dil_iter={dil_iter} send_resid={send_resid} tile={tt}")

    print("KERNEL_OK")
</pallas_src>

<mosaic_0001>
module attributes {stable_mosaic.version = 11 : i64} {
  func.func @kernel(%arg0: i32, %arg1: i32, %arg2: memref<1x8x4xf32, #tpu.memory_space<vmem>>, %arg3: memref<4x32xf32, #tpu.memory_space<vmem>>, %arg4: memref<1x32xf32, #tpu.memory_space<vmem>>, %arg5: memref<1xf32, #tpu.memory_space<smem>>, %arg6: memref<1x8x32xf32, #tpu.memory_space<vmem>>, %arg7: memref<1x1x2x32xf32, #tpu.memory_space<vmem>>, %arg8: memref<1x1x2x32xf32, #tpu.memory_space<vmem>>, %arg9: memref<1x1x1x32xf32, #tpu.memory_space<vmem>>, %arg10: memref<1x1x1x32xf32, #tpu.memory_space<vmem>>) attributes {dimension_semantics = [#tpu.dimension_semantics<parallel>, #tpu.dimension_semantics<parallel>], iteration_bounds = array<i64: 2, 2>, scalar_prefetch = 0 : i64, scratch_operands = 0 : i64, tpu.core_type = #tpu.core_type<tc>, window_params = [{transform_indices = @transform_0, window_bounds = array<i64: 1, 8, 4>}, {pipeline_mode = #tpu.pipeline_mode<synchronous>, transform_indices = @transform_1, window_bounds = array<i64: 4, 32>}, {pipeline_mode = #tpu.pipeline_mode<synchronous>, transform_indices = @transform_2, window_bounds = array<i64: 1, 32>}, {transform_indices = @transform_3, window_bounds = array<i64: 1>}, {transform_indices = @transform_4, window_bounds = array<i64: 1, 8, 32>}, {transform_indices = @transform_5, window_bounds = array<i64: 1, 1, 2, 32>}, {transform_indices = @transform_6, window_bounds = array<i64: 1, 1, 2, 32>}, {transform_indices = @transform_7, window_bounds = array<i64: 1, 1, 1, 32>}, {transform_indices = @transform_8, window_bounds = array<i64: 1, 1, 1, 32>}]} {
    %c0 = arith.constant 0 : index
    %c0_0 = arith.constant 0 : index
    %c0_1 = arith.constant 0 : index
    %0 = vector.load %arg2[%c0, %c0_0, %c0_1] : memref<1x8x4xf32, #tpu.memory_space<vmem>>, vector<1x8x4xf32>
    %1 = vector.shape_cast %0 : vector<1x8x4xf32> to vector<8x4xf32>
    %c0_2 = arith.constant 0 : index
    %c0_3 = arith.constant 0 : index
    %2 = vector.load %arg3[%c0_2, %c0_3] : memref<4x32xf32, #tpu.memory_space<vmem>>, vector<4x32xf32>
    %cst = arith.constant dense<0.000000e+00> : vector<8x32xf32>
    %3 = tpu.matmul %1, %2, %cst {dimension_numbers = #tpu.dot_dimension_numbers<[1], [0], [0], [1], [0, 0, 1, 1], [], []>} : vector<8x4xf32>, vector<4x32xf32>, vector<8x32xf32> -> vector<8x32xf32>
    %c0_4 = arith.constant 0 : index
    %c0_5 = arith.constant 0 : index
    %4 = vector.load %arg4[%c0_4, %c0_5] : memref<1x32xf32, #tpu.memory_space<vmem>>, vector<1x32xf32>
    %5 = vector.broadcast %4 : vector<1x32xf32> to vector<8x32xf32>
    %6 = arith.addf %3, %5 : vector<8x32xf32>
    %c0_6 = arith.constant 0 : index
    %7 = memref.load %arg5[%c0_6] : memref<1xf32, #tpu.memory_space<smem>>
    %cst_7 = arith.constant 0.000000e+00 : f32
    %8 = vector.broadcast %cst_7 : f32 to vector<8x32xf32>
    %9 = arith.cmpf oge, %6, %8 : vector<8x32xf32>
    %10 = vector.broadcast %7 : f32 to vector<8x32xf32>
    %11 = arith.mulf %10, %6 : vector<8x32xf32>
    %12 = arith.select %9, %6, %11 : vector<8x32xi1>, vector<8x32xf32>
    %c0_8 = arith.constant 0 : index
    %c0_9 = arith.constant 0 : index
    %c0_10 = arith.constant 0 : index
    %13 = vector.load %arg6[%c0_8, %c0_9, %c0_10] : memref<1x8x32xf32, #tpu.memory_space<vmem>>, vector<1x8x32xf32>
    %14 = vector.shape_cast %13 : vector<1x8x32xf32> to vector<8x32xf32>
    %15 = vector.shape_cast %12 : vector<8x32xf32> to vector<1x8x32xf32>
    tpu.vector_store %arg6[%c0_8, %c0_9, %c0_10], %15 {strides = array<i32>} : memref<1x8x32xf32, #tpu.memory_space<vmem>>, vector<1x8x32xf32>,
    %16 = vector.extract_strided_slice %12 {offsets = [0, 0], sizes = [2, 32], strides = [1, 1]} : vector<8x32xf32> to vector<2x32xf32>
    %c0_11 = arith.constant 0 : index
    %c0_12 = arith.constant 0 : index
    %c0_13 = arith.constant 0 : index
    %c0_14 = arith.constant 0 : index
    %17 = vector.load %arg7[%c0_11, %c0_12, %c0_13, %c0_14] : memref<1x1x2x32xf32, #tpu.memory_space<vmem>>, vector<1x1x2x32xf32>
    %18 = vector.shape_cast %17 : vector<1x1x2x32xf32> to vector<2x32xf32>
    %19 = vector.shape_cast %16 : vector<2x32xf32> to vector<1x1x2x32xf32>
    tpu.vector_store %arg7[%c0_11, %c0_12, %c0_13, %c0_14], %19 {strides = array<i32>} : memref<1x1x2x32xf32, #tpu.memory_space<vmem>>, vector<1x1x2x32xf32>,
    %20 = vector.extract_strided_slice %12 {offsets = [6, 0], sizes = [2, 32], strides = [1, 1]} : vector<8x32xf32> to vector<2x32xf32>
    %c0_15 = arith.constant 0 : index
    %c0_16 = arith.constant 0 : index
    %c0_17 = arith.constant 0 : index
    %c0_18 = arith.constant 0 : index
    %21 = vector.load %arg8[%c0_15, %c0_16, %c0_17, %c0_18] : memref<1x1x2x32xf32, #tpu.memory_space<vmem>>, vector<1x1x2x32xf32>
    %22 = vector.shape_cast %21 : vector<1x1x2x32xf32> to vector<2x32xf32>
    %23 = vector.shape_cast %20 : vector<2x32xf32> to vector<1x1x2x32xf32>
    tpu.vector_store %arg8[%c0_15, %c0_16, %c0_17, %c0_18], %23 {strides = array<i32>} : memref<1x1x2x32xf32, #tpu.memory_space<vmem>>, vector<1x1x2x32xf32>,
    %cst_19 = arith.constant dense<0.000000e+00> : vector<32xf32>
    %24 = vector.multi_reduction <add>, %12, %cst_19 [0] : vector<8x32xf32> to vector<32xf32>
    %25 = vector.shape_cast %24 : vector<32xf32> to vector<1x32xf32>
    %26 = vector.shape_cast %25 : vector<1x32xf32> to vector<1x1x1x32xf32>
    %c0_20 = arith.constant 0 : index
    %c0_21 = arith.constant 0 : index
    %c0_22 = arith.constant 0 : index
    %c0_23 = arith.constant 0 : index
    %27 = vector.load %arg9[%c0_20, %c0_21, %c0_22, %c0_23] : memref<1x1x1x32xf32, #tpu.memory_space<vmem>>, vector<1x1x1x32xf32>
    tpu.vector_store %arg9[%c0_20, %c0_21, %c0_22, %c0_23], %26 {strides = array<i32>} : memref<1x1x1x32xf32, #tpu.memory_space<vmem>>, vector<1x1x1x32xf32>,
    %28 = arith.mulf %12, %12 : vector<8x32xf32>
    %cst_24 = arith.constant dense<0.000000e+00> : vector<32xf32>
    %29 = vector.multi_reduction <add>, %28, %cst_24 [0] : vector<8x32xf32> to vector<32xf32>
    %30 = vector.shape_cast %29 : vector<32xf32> to vector<1x32xf32>
    %31 = vector.shape_cast %30 : vector<1x32xf32> to vector<1x1x1x32xf32>
    %c0_25 = arith.constant 0 : index
    %c0_26 = arith.constant 0 : index
    %c0_27 = arith.constant 0 : index
    %c0_28 = arith.constant 0 : index
    %32 = vector.load %arg10[%c0_25, %c0_26, %c0_27, %c0_28] : memref<1x1x1x32xf32, #tpu.memory_space<vmem>>, vector<1x1x1x32xf32>
    tpu.vector_store %arg10[%c0_25, %c0_26, %c0_27, %c0_28], %31 {strides = array<i32>} : memref<1x1x1x32xf32, #tpu.memory_space<vmem>>, vector<1x1x1x32xf32>,
    return
  }
  func.func @transform_0(%arg0: i32, %arg1: i32) -> (i32, i32, i32) {
    %c0_i32 = arith.constant 0 : i32
    %c0_i32_0 = arith.constant 0 : i32
    return %arg0, %arg1, %c0_i32 : i32, i32, i32
  }
  func.func @transform_1(%arg0: i32, %arg1: i32) -> (i32, i32) {
    %c0_i32 = arith.constant 0 : i32
    %c0_i32_0 = arith.constant 0 : i32
    %c0_i32_1 = arith.constant 0 : i32
    return %c0_i32, %c0_i32_0 : i32, i32
  }
  func.func @transform_2(%arg0: i32, %arg1: i32) -> (i32, i32) {
    %c0_i32 = arith.constant 0 : i32
    %c0_i32_0 = arith.constant 0 : i32
    %c0_i32_1 = arith.constant 0 : i32
    return %c0_i32, %c0_i32_0 : i32, i32
  }
  func.func @transform_3(%arg0: i32, %arg1: i32) -> i32 {
    %c0_i32 = arith.constant 0 : i32
    %c0_i32_0 = arith.constant 0 : i32
    return %c0_i32 : i32
  }
  func.func @transform_4(%arg0: i32, %arg1: i32) -> (i32, i32, i32) {
    %c0_i32 = arith.constant 0 : i32
    %c0_i32_0 = arith.constant 0 : i32
    return %arg0, %arg1, %c0_i32 : i32, i32, i32
  }
  func.func @transform_5(%arg0: i32, %arg1: i32) -> (i32, i32, i32, i32) {
    %c0_i32 = arith.constant 0 : i32
    %c0_i32_0 = arith.constant 0 : i32
    %c0_i32_1 = arith.constant 0 : i32
    return %arg0, %arg1, %c0_i32, %c0_i32_0 : i32, i32, i32, i32
  }
  func.func @transform_6(%arg0: i32, %arg1: i32) -> (i32, i32, i32, i32) {
    %c0_i32 = arith.constant 0 : i32
    %c0_i32_0 = arith.constant 0 : i32
    %c0_i32_1 = arith.constant 0 : i32
    return %arg0, %arg1, %c0_i32, %c0_i32_0 : i32, i32, i32, i32
  }
  func.func @transform_7(%arg0: i32, %arg1: i32) -> (i32, i32, i32, i32) {
    %c0_i32 = arith.constant 0 : i32
    %c0_i32_0 = arith.constant 0 : i32
    %c0_i32_1 = arith.constant 0 : i32
    return %arg0, %arg1, %c0_i32, %c0_i32_0 : i32, i32, i32, i32
  }
  func.func @transform_8(%arg0: i32, %arg1: i32) -> (i32, i32, i32, i32) {
    %c0_i32 = arith.constant 0 : i32
    %c0_i32_0 = arith.constant 0 : i32
    %c0_i32_1 = arith.constant 0 : i32
    return %arg0, %arg1, %c0_i32, %c0_i32_0 : i32, i32, i32, i32
  }
}

</mosaic_0001>

<bundles_post_ra>
// kernel: tpu_custom_call.1
= control target key start
LH: loop header
LB: loop body
LE: loop exit
PB: predicated region body
PF: predicated region fallthrough
CT: control target
= control target key end

     0   :  { %s1480_s0 = inlined_call_operand.vmem [shape: f32[2,16,4], index: 0, kind: input, shape index: {}]   ;;  %s1481_s1 = inlined_call_operand.vmem [shape: f32[4,32], index: 1, kind: input, shape index: {}]   ;;  %s1482_s2 = inlined_call_operand.vmem [shape: f32[1,32], index: 2, kind: input, shape index: {}]   ;;  %s1483_s3 = inlined_call_operand.<no memory space> [shape: f32[1], index: 3, kind: input, shape index: {}]   ;;  %s1484_s4 = inlined_call_operand.hbm [shape: f32[2,16,32], index: 4, kind: output, shape index: {0}]   ;;  %s1485_s5 = inlined_call_operand.hbm [shape: f32[2,2,2,32], index: 5, kind: output, shape index: {1}]   ;;  %s1486_s6 = inlined_call_operand.hbm [shape: f32[2,2,2,32], index: 6, kind: output, shape index: {2}]   ;;  %s1487_s7 = inlined_call_operand.hbm [shape: f32[2,2,1,32], index: 7, kind: output, shape index: {3}]   ;;  %s1488_s8 = inlined_call_operand.hbm [shape: f32[2,2,1,32], index: 8, kind: output, shape index: {4}]  }
   0x1   :  { %1495 = sst [smem:[#allocation18_spill]] %s1480_s0 }
   0x2   :  { %1496 = sst [smem:[#allocation19_spill]] %s1481_s1 }
   0x3   :  { %1497 = sst [smem:[#allocation20_spill]] %s1482_s2 }
   0x4   :  { %14 = sst [smem:[#allocation2]] %s1483_s3 }
   0x5   :  { %15 = vsyncpa [#allocation4], 0 }
   0x6   :  { %17 = vsyncpa [#allocation4 + $0x1], 0 }
   0x7   :  { %18 = vsyncpa [#allocation6], 0 }
   0x8   :  { %20 = vsyncpa [#allocation6 + $0x1], 0 }
   0x9   :  { %21 = vsyncpa [#allocation9], 0 }
   0xa   :  { %23 = vsyncpa [#allocation9 + $0x1], 0  ;;  %s1180_s29 = smov 0   ;;  %s1182_s30 = smov 0  }
   0xb   :  { %s1184_s9 = smov 0   ;;  %s1186_s10 = smov 0  }
   0xc   :  { %s1188_s11 = smov 0   ;;  %s1190_s12 = smov 0  }
   0xd   :  { %s1192_s13 = smov 0   ;;  %s1194_s3 = smov 0  }
   0xe LB: > { %1498 = sst [smem:[#allocation14_spill]] %s1115_s12  ;;  %s1490_s14 = sadd.s32 4294967295, %s1123_s3   ;;  %s1123_s3 = sphi %s1194_s3, %s29_s3   ;;  %s1119_s13 = sphi %s1192_s13, %s1512_s13   ;;  %s1115_s12 = sphi %s1190_s12, %s1511_s12   ;;  %s1111_s11 = sphi %s1188_s11, %s1510_s11   ;;  %s1107_s10 = sphi %s1186_s10, %s1509_s10   ;;  %s1103_s9 = sphi %s1184_s9, %s1515_s9   ;;  %s1099_s30 = sphi %s1182_s30, %s1514_s30   ;;  %s1095_s29 = sphi %s1180_s29, %s1513_s29  }
   0xf   : > { %1499 = sst [smem:[#allocation15_spill]] %s1119_s13  ;;  %s1489_s15 = sadd.s32 4294967294, %s1123_s3  }
  0x10   : > { %s38_s16 = sadd.s32 1, %s1115_s12  ;;  %s41_s17 = sadd.s32 1, %s1119_s13 }
  0x11   : > { %p39_p0 = scmp.ge.s32.totalorder %s38_s16, 2  ;;  %p151_p1 = scmp.ne.s32.totalorder %s1103_s9, %s1099_s30 }
  0x12   : > { %p152_p2 = scmp.eq.s32.totalorder %s1490_s14, 3  ;;  %p157_p5 = scmp.ne.s32.totalorder %s1099_s30, %s1095_s29 }
  0x13   : > { %s1517_s16 = smov (%p39_p0, %s38_s16), 0  ;;  %s1519_s17 = smov (!%p39_p0, %s41_s17), %s1119_s13 }
  0x14   : > { %1500 = sst [smem:[#allocation16_spill]] %s1517_s16  ;;  %s137_s18 = ssub.s32 %s1115_s12, %s1517_s16 }
  0x15   : > { %p1233_p3 = por %p152_p2, %p151_p1  ;;  %p43_p4 = scmp.ge.s32.totalorder %s1519_s17, 2 }
  0x16   : > { %p158_p6 = scmp.eq.s32.totalorder %s1489_s15, 3  ;;  %p785_p7 = scmp.ge.s32.totalorder %s1123_s3, 1 }
  0x17   : > { %s1521_s17 = smov (%p43_p4, %s1519_s17), 0  ;;  %p308_p9 = scmp.lt.s32.totalorder %s1123_s3, 5 }
  0x18   : > { %1502 = sst [smem:[#allocation17_spill]] %s1521_s17  ;;  %p1244_p8 = por %p158_p6, %p157_p5 }
  0x19   : > { %s136_s21 = ssub.s32 %s1119_s13, %s1521_s17  ;;  %s141_s22 = sadd.s32 1, %s1103_s9 }
  0x1a   : > { %s138_s23 = sor.u32 %s137_s18, %s136_s21  ;;  %p309_p10 = pnand %p785_p7, %p308_p9 }
  0x1b   : > { %p139_p11 = scmp.eq.s32.totalorder %s138_s23, 0  ;;  %s1504_s1 = sld [smem:[#allocation19_spill]] (!%p309_p10)  ;;  %vm384_vm0 = vcmask (!%p309_p10), 1043456   ;;  %v1125_v1 = vmov (!%p309_p10), 0.0   ;;  %vm1126_vm1 = vmmov (!%p309_p10), 0   ;;  %vm380_vm2 = vcmask (!%p309_p10), 31744  }
  0x1c   : > { %312 = sbr.rel (%p309_p10) target bundleno = 373 (0x175), region = 36  ;;  %p363_p12 = scmp.lt.s32.totalorder (!%p309_p10), %s1111_s11, 1  ;;  %811 = vmatprep.subr.mxu0 (!%p309_p10), %v1125_v1  ;;  %813 = vmatprep.mubr.msk.f32.mxu0 (!%p309_p10), %vm1126_vm1, %v1125_v1  ;;  %vm463_vm3 = vcmask (!%p309_p10), 261120   ;;  %vm465_vm5 = vcmask (!%p309_p10), 254976   ;;  %vm467_vm6 = vcmask (!%p309_p10), 261126  }
  0x1d   : > { %s1253_s24 = scalar_select %p139_p11, %s1103_s9, %s141_s22  }
  0x1e   : > { %p365_p13 = scmp.lt.s32.totalorder (!%p309_p10), %s1107_s10, 1  ;;  %s1505_s0 = sld [smem:[#allocation18_spill]] (!%p309_p10) }
  0x1f   : > { %s458_s15 = sld [smem:[#allocation2]] (!%p309_p10)  ;;  %s1266_s14 = sand.u32 (!%p309_p10), 1, %s1099_s30  }
  0x20   : > { %s787_s17 = sshll.u32 (!%p309_p10), %s1266_s14, 1  ;;  %s1506_s2 = sld [smem:[#allocation20_spill]] (!%p309_p10) }
  0x21   : > { %v372_v0 = vld [vmem:[%s1504_s1] sm:$0xf] (!%p309_p10)  ;;  %s797_s1 = sshll.u32 (!%p309_p10), %s1111_s11, 1  ;;  %s343_s25 = scalar_lea.vmem (!%p309_p10), [#allocation5], %s787_s17 }
  0x22   : > { %812 = vmatpush3.msk.msra.mxu0 (!%p309_p10), %vm384_vm0, %v372_v0  ;;  %s1271_s16 = sadd.s32 (!%p309_p10), %s1107_s10, %s797_s1 }
  0x23   : > { %s364_s27 = scalar_select %p363_p12, %s1111_s11, 1 }
  0x24   : > { %s366_s28 = scalar_select %p365_p13, %s1107_s10, 1 }
  0x25   : > { %s789_s18 = sshll.u32 %s364_s27, 1  ;;  %s786_s27 = sshll.u32 %s1266_s14, 3  ;;  %v460_v5 = vstv %s458_s15 }
  0x26   : > { %s368_s21 = sadd.s32 %s789_s18, %s366_s28  ;;  %v791_v3 = vld [vmem:[%s1506_s2] ss:$0 sm:$0xff]  ;;  %s800_s23 = sshll.u32 %s1271_s16, 5 }
  0x27   : > { %s790_s22 = sshll.u32 %s368_s21, 3  ;;  %s1507_s21 = sadd.s32 4294967295, %s1123_s3  }
  0x28   : > { %s370_s26 = scalar_lea.vmem %s1505_s0, %s790_s22  ;;  %s1279_s22 = sand.u32 1, %s1507_s21  }
  0x29   : > { %v371_v2 = vld [vmem:[%s370_s26] sm:$0xff]  ;;  %s536_s11 = sshll.u32 %s343_s25, 4  ;;  %s798_s1 = sshll.u32 %s1271_s16, 7  ;;  %s1288_s11 = int_to_ptr.vmem [resolvable:$true] %s536_s11 }
  0x2a   : > { %814 = vmatmul.mubr.msk.f32.vlgmr.msra.gmra.mrb[0].mxu0 %vm380_vm2, %v371_v2  ;;  %s336_s10 = scalar_lea.vmem [#allocation3], %s786_s27  ;;  %s1286_s18 = scalar_lea.hbm %s1485_s5, %s800_s23 }
  0x2b   : > { %s521_s26 = sshll.u32 %s336_s10, 4  ;;  %s350_s15 = scalar_lea.vmem [#allocation7], %s787_s17  ;;  %s1295_s26 = int_to_ptr.vmem [resolvable:$true] %s521_s26 }
  0x2c   : > { %s551_s21 = sshll.u32 %s350_s15, 4  ;;  %s1293_s13 = scalar_lea.hbm %s1484_s4, %s798_s1  ;;  %s1306_s21 = int_to_ptr.vmem [resolvable:$true] %s551_s21 }
  0x2d   : > { %s1303_s28 = scalar_lea.hbm %s1486_s6, %s800_s23  ;;  %s493_s2 = scalar_lea.sflag [#allocation6], %s1279_s22 }
  0x2e   : > { %s909_s1 = scalar_lea.vmem %s1288_s11, 32  ;;  %s1127_s27 = smov [#allocation5]  }
  0x2f   : > { %p910_p0 = scmp.ne.s32.totalorder %s1288_s11, %s909_s1 }
  0x31   : > { %p911_p1 = pnand %p910_p0, %p1233_p3 }
  0x33   : > { %p912_p2 = pneg %p911_p1 }
  0xfd   : > { %v454_v4 = vpop.f32.mrb[0].mxu0 }
  0xfe   : > { %v455_v6 = vadd.f32 %v791_v3, %v454_v4  ;;  %v815_v7 = vpop.f32.mrb[1].mxu0 }
 0x100   : > { %vm459_vm4 = vcmp.ge.f32.partialorder %v455_v6, 0.0  ;;  %v461_v8 = vmul.f32 %v460_v5, %v455_v6 }
 0x102   : > { %v462_v9 = vsel %vm459_vm4, %v455_v6, %v461_v8 }
 0x103   : > { %v1298_v10 = vsel %vm463_vm3, %v462_v9, 0.0  ;;  %v478_v11 = vmul.f32 %v462_v9, %v462_v9  ;;  %466 = vst.msk [vmem:[%s343_s25] sm:$0x3] %vm465_vm5, %v462_v9  ;;  %s913_s25 = sshll.u32 %s1127_s27, 4  ;;  %s914_s25 = int_to_ptr.vmem [resolvable:$false] %s913_s25 }
 0x104   : > { %464 = vst.msk [vmem:[%s336_s10] sm:$0xff] %vm463_vm3, %v462_v9  ;;  %v470_v12 = vrot.slane %v1298_v10, 4  ;;  %s915_s12 = scalar_lea.vmem %s914_s25, 64  ;;  %p916_p4 = scmp.lt.s32.totalorder %s1288_s11, %s914_s25 }
 0x105   : > { %468 = vst.msk [vmem:[%s350_s15 - $0x6] sm:$0xc0] %vm467_vm6, %v462_v9  ;;  %p917_p5 = scmp.lt.s32.totalorder %s915_s12, %s909_s1 }
 0x107   : > { %p918_p6 = por %p917_p5, %p916_p4 }
 0x109   : > { %p919_p7 = pnand %p918_p6, %p912_p2 }
 0x10b   : > { %922 = shalt.err (!%p919_p7)
}
 0x10c   : > { %s923_s23 = scalar_lea.hbm %s1286_s18, 32  ;;  %s927_s0 = scalar_lea.hbm %s1485_s5, 128 }
 0x10d   : > { %p924_p9 = scmp.ne.s32.totalorder %s1286_s18, %s923_s23  ;;  %p928_p12 = scmp.lt.u32.totalorder %s1286_s18, %s1485_s5 }
 0x10e   : > { %p929_p13 = scmp.lt.u32.totalorder %s927_s0, %s923_s23  ;;  %p931_p1 = scmp.lt.u32.totalorder %s923_s23, %s1286_s18 }
 0x10f   : > { %p925_p10 = pnand %p924_p9, %p1233_p3 }
 0x110   : > { %p930_p0 = por %p929_p13, %p928_p12 }
 0x111   : > { %p926_p11 = pneg %p925_p10 }
 0x112   : > { %p932_p2 = por %p931_p1, %p930_p0 }
 0x114   : > { %p933_p4 = pnand %p932_p2, %p926_p11 }
 0x116   : > { %936 = shalt.err (!%p933_p4)
}
 0x117   : > { %817 = dma.vmem_to_hbm [thread:$0]  (%p1233_p3), %s1288_s11, 32, %s1286_s18, %s493_s2   ;;  %v479_v13 = vsel %vm463_vm3, %v478_v11, 0.0 }
 0x118   : > { %s488_s12 = scalar_lea.sflag [#allocation4], %s1266_s14  ;;  %s937_s1 = scalar_lea.vmem %s1295_s26, 128 }
 0x119   : > { %p938_p5 = scmp.ne.s32.totalorder %s1295_s26, %s937_s1  ;;  %s1128_s25 = smov [#allocation3]  }
 0x11a   : > { %s941_s23 = sshll.u32 %s1128_s25, 4  ;;  %s942_s23 = int_to_ptr.vmem [resolvable:$false] %s941_s23 }
 0x11b   : > { %p939_p6 = pnand %p938_p5, %p1233_p3  ;;  %s943_s10 = scalar_lea.vmem %s942_s23, 256 }
 0x11c   : > { %p944_p9 = scmp.lt.s32.totalorder %s1295_s26, %s942_s23  ;;  %p945_p10 = scmp.lt.s32.totalorder %s943_s10, %s937_s1 }
 0x11d   : > { %p940_p7 = pneg %p939_p6 }
 0x11e   : > { %p946_p11 = por %p945_p10, %p944_p9 }
 0x120   : > { %p947_p12 = pnand %p946_p11, %p940_p7 }
 0x122   : > { %950 = shalt.err (!%p947_p12)
}
 0x123   : > { %s951_s11 = scalar_lea.hbm %s1293_s13, 128  ;;  %s955_s0 = scalar_lea.hbm %s1484_s4, 512 }
 0x124   : > { %p952_p13 = scmp.ne.s32.totalorder %s1293_s13, %s951_s11  ;;  %p956_p2 = scmp.lt.u32.totalorder %s1293_s13, %s1484_s4 }
 0x125   : > { %p957_p4 = scmp.lt.u32.totalorder %s955_s0, %s951_s11  ;;  %p959_p6 = scmp.lt.u32.totalorder %s951_s11, %s1293_s13 }
 0x126   : > { %p953_p0 = pnand %p952_p13, %p1233_p3 }
 0x127   : > { %p958_p5 = por %p957_p4, %p956_p2 }
 0x128   : > { %p954_p1 = pneg %p953_p0 }
 0x129   : > { %p960_p7 = por %p959_p6, %p958_p5 }
 0x12b   : > { %p961_p9 = pnand %p960_p7, %p954_p1 }
 0x12d   : > { %964 = shalt.err (!%p961_p9)
}
 0x12e   : > { %816 = dma.vmem_to_hbm [thread:$0]  (%p1233_p3), %s1295_s26, 128, %s1293_s13, %s488_s12   ;;  %v480_v14 = vrot.slane %v479_v13, 4  ;;  %v471_v15 = vadd.f32 %v470_v12, %v1298_v10 }
 0x12f   : > { %s965_s1 = scalar_lea.vmem %s1306_s21, 32  ;;  %s1129_s25 = smov [#allocation7]  }
 0x130   : > { %p966_p10 = scmp.ne.s32.totalorder %s1306_s21, %s965_s1  ;;  %s969_s23 = sshll.u32 %s1129_s25, 4  ;;  %s970_s23 = int_to_ptr.vmem [resolvable:$false] %s969_s23 }
 0x131   : > { %s971_s10 = scalar_lea.vmem %s970_s23, 64  ;;  %p972_p13 = scmp.lt.s32.totalorder %s1306_s21, %s970_s23 }
 0x132   : > { %p967_p11 = pnand %p966_p10, %p1233_p3  ;;  %p973_p0 = scmp.lt.s32.totalorder %s971_s10, %s965_s1 }
 0x134   : > { %p968_p12 = pneg %p967_p11  ;;  %p974_p1 = por %p973_p0, %p972_p13 }
 0x136   : > { %p975_p2 = pnand %p974_p1, %p968_p12 }
 0x138   : > { %978 = shalt.err (!%p975_p2)
}
 0x139   : > { %s979_s13 = scalar_lea.hbm %s1303_s28, 32  ;;  %s983_s11 = scalar_lea.hbm %s1486_s6, 128 }
 0x13a   : > { %p980_p4 = scmp.ne.s32.totalorder %s1303_s28, %s979_s13  ;;  %p984_p7 = scmp.lt.u32.totalorder %s1303_s28, %s1486_s6 }
 0x13b   : > { %p985_p9 = scmp.lt.u32.totalorder %s983_s11, %s979_s13  ;;  %p987_p11 = scmp.lt.u32.totalorder %s979_s13, %s1303_s28 }
 0x13c   : > { %p981_p5 = pnand %p980_p4, %p1233_p3 }
 0x13d   : > { %p986_p10 = por %p985_p9, %p984_p7 }
 0x13e   : > { %p982_p6 = pneg %p981_p5 }
 0x13f   : > { %p988_p12 = por %p987_p11, %p986_p10 }
 0x141   : > { %p989_p13 = pnand %p988_p12, %p982_p6 }
 0x143   : > { %992 = shalt.err (!%p989_p13)
}
 0x144   : > { %818 = dma.vmem_to_hbm [thread:$0]  (%p1233_p3), %s1306_s21, 32, %s1303_s28, %s493_s2   ;;  %v472_v16 = vrot.slane %v471_v15, 2  ;;  %v481_v17 = vadd.f32 %v480_v14, %v479_v13  ;;  %vm476_vm7 = vcmask 253952  }
 0x145   : > { %s804_s0 = sshll.u32 %s1271_s16, 4  ;;  %s356_s17 = scalar_lea.vmem [#allocation8], %s1266_s14 }
 0x146   : > { %v473_v18 = vadd.f32 %v472_v16, %v471_v15  ;;  %v482_v19 = vrot.slane %v481_v17, 2  ;;  %s566_s27 = sshll.u32 %s356_s17, 4  ;;  %s362_s1 = scalar_lea.vmem [#allocation10], %s1266_s14  ;;  %s1390_s27 = int_to_ptr.vmem [resolvable:$true] %s566_s27 }
 0x147   : > { %s581_s25 = sshll.u32 %s362_s1, 4  ;;  %s1388_s21 = scalar_lea.hbm %s1487_s7, %s804_s0  ;;  %s1398_s25 = int_to_ptr.vmem [resolvable:$true] %s581_s25 }
 0x148   : > { %v474_v20 = vrot.slane %v473_v18, 1  ;;  %v483_v21 = vadd.f32 %v482_v19, %v481_v17  ;;  %s1396_s2 = scalar_lea.hbm %s1488_s8, %s804_s0  ;;  %s503_s13 = scalar_lea.sflag [#allocation9], %s1279_s22 }
 0x149   : > { %s993_s26 = scalar_lea.vmem %s1390_s27, 16  ;;  %s1130_s12 = smov [#allocation8]  }
 0x14a   : > { %v475_v22 = vadd.f32 %v474_v20, %v473_v18  ;;  %v484_v23 = vrot.slane %v483_v21, 1  ;;  %p994_p0 = scmp.ne.s32.totalorder %s1390_s27, %s993_s26  ;;  %s997_s11 = sshll.u32 %s1130_s12, 4  ;;  %s998_s11 = int_to_ptr.vmem [resolvable:$false] %s997_s11 }
 0x14b   : > { %s999_s18 = scalar_lea.vmem %s998_s11, 32  ;;  %p1000_p4 = scmp.lt.s32.totalorder %s1390_s27, %s998_s11 }
 0x14c   : > { %477 = vst.msk [vmem:[%s356_s17] sm:$0x1] %vm476_vm7, %v475_v22  ;;  %v485_v24 = vadd.f32 %v484_v23, %v483_v21  ;;  %p995_p1 = pnand %p994_p0, %p1233_p3  ;;  %p1001_p5 = scmp.lt.s32.totalorder %s999_s18, %s993_s26 }
 0x14e   : > { %p996_p2 = pneg %p995_p1  ;;  %p1002_p6 = por %p1001_p5, %p1000_p4 }
 0x150   : > { %p1003_p7 = pnand %p1002_p6, %p996_p2 }
 0x152   : > { %1006 = shalt.err (!%p1003_p7)
}
 0x153   : > { %s1007_s15 = scalar_lea.hbm %s1388_s21, 16  ;;  %s1011_s23 = scalar_lea.hbm %s1487_s7, 64 }
 0x154   : > { %p1008_p9 = scmp.ne.s32.totalorder %s1388_s21, %s1007_s15  ;;  %p1012_p12 = scmp.lt.u32.totalorder %s1388_s21, %s1487_s7 }
 0x155   : > { %p1013_p13 = scmp.lt.u32.totalorder %s1011_s23, %s1007_s15  ;;  %p1015_p1 = scmp.lt.u32.totalorder %s1007_s15, %s1388_s21 }
 0x156   : > { %p1009_p10 = pnand %p1008_p9, %p1233_p3 }
 0x157   : > { %p1014_p0 = por %p1013_p13, %p1012_p12 }
 0x158   : > { %p1010_p11 = pneg %p1009_p10 }
 0x159   : > { %p1016_p2 = por %p1015_p1, %p1014_p0 }
 0x15b   : > { %p1017_p4 = pnand %p1016_p2, %p1010_p11 }
 0x15d   : > { %1020 = shalt.err (!%p1017_p4)
}
 0x15e   : > { %819 = dma.vmem_to_hbm [thread:$0]  (%p1233_p3), %s1390_s27, 16, %s1388_s21, %s503_s13   ;;  %486 = vst.msk [vmem:[%s362_s1] sm:$0x1] %vm476_vm7, %v485_v24 }
 0x15f   : > { %s1021_s28 = scalar_lea.vmem %s1398_s25, 16  ;;  %s1131_s26 = smov [#allocation10]  }
 0x160   : > { %p1022_p5 = scmp.ne.s32.totalorder %s1398_s25, %s1021_s28  ;;  %s1025_s12 = sshll.u32 %s1131_s26, 4  ;;  %s1026_s12 = int_to_ptr.vmem [resolvable:$false] %s1025_s12 }
 0x161   : > { %s1027_s11 = scalar_lea.vmem %s1026_s12, 32  ;;  %p1028_p9 = scmp.lt.s32.totalorder %s1398_s25, %s1026_s12 }
 0x162   : > { %p1023_p6 = pnand %p1022_p5, %p1233_p3  ;;  %p1029_p10 = scmp.lt.s32.totalorder %s1027_s11, %s1021_s28 }
 0x164   : > { %p1024_p7 = pneg %p1023_p6  ;;  %p1030_p11 = por %p1029_p10, %p1028_p9 }
 0x166   : > { %p1031_p12 = pnand %p1030_p11, %p1024_p7 }
 0x168   : > { %1034 = shalt.err (!%p1031_p12)
}
 0x169   : > { %s1035_s14 = scalar_lea.hbm %s1396_s2, 16  ;;  %s1039_s21 = scalar_lea.hbm %s1488_s8, 64 }
 0x16a   : > { %p1036_p13 = scmp.ne.s32.totalorder %s1396_s2, %s1035_s14  ;;  %p1040_p2 = scmp.lt.u32.totalorder %s1396_s2, %s1488_s8 }
 0x16b   : > { %p1041_p4 = scmp.lt.u32.totalorder %s1039_s21, %s1035_s14  ;;  %p1043_p6 = scmp.lt.u32.totalorder %s1035_s14, %s1396_s2 }
 0x16c   : > { %p1037_p0 = pnand %p1036_p13, %p1233_p3 }
 0x16d   : > { %p1042_p5 = por %p1041_p4, %p1040_p2 }
 0x16e   : > { %p1038_p1 = pneg %p1037_p0 }
 0x16f   : > { %p1044_p7 = por %p1043_p6, %p1042_p5 }
 0x171   : > { %p1045_p9 = pnand %p1044_p7, %p1038_p1 }
 0x173   : > { %1048 = shalt.err (!%p1045_p9)
}
 0x174   : > { %820 = dma.vmem_to_hbm [thread:$0]  (%p1233_p3), %s1398_s25, 16, %s1396_s2, %s503_s13  }
 0x175 PF: > { %p842_p10 = scmp.ge.s32.totalorder %s1123_s3, 2  ;;  %s593_s0 = sand.u32 1, %s1095_s29  }
 0x176   : > { %s594_s17 = scalar_lea.sflag [#allocation4], %s593_s0 }
 0x177   : > { %p827_p11 = pnand %p842_p10, %p1244_p8 }
 0x179   : > { %1082 = dma.done.wait (!%p827_p11), %s594_s17, 128  }
 0x17a   : > { %1084 = vsyncadd (!%p827_p11), %s594_s17, 4294967168  ;;  %s1508_s23 = sadd.s32 4294967294, %s1123_s3  }
 0x17b   : > { %s602_s10 = sand.u32 1, %s1508_s23  }
 0x17c   : > { %s603_s19 = scalar_lea.sflag [#allocation6], %s602_s10 }
 0x17d   : > { %1086 = dma.done.wait (!%p827_p11), %s603_s19, 64  }
 0x17e   : > { %1088 = vsyncadd (!%p827_p11), %s603_s19, 4294967232  ;;  %s621_s22 = scalar_lea.sflag [#allocation9], %s602_s10 }
 0x17f   : > { %1090 = dma.done.wait (!%p827_p11), %s621_s22, 32  }
 0x180   : > { %1092 = vsyncadd (!%p827_p11), %s621_s22, 4294967264  ;;  %s29_s3 = sadd.s32 1, %s1123_s3   ;;  %s1509_s10 = sld [smem:[#allocation14_spill]] }
 0x181   : > { %p26_p3 = scmp.ge.s32.totalorder %s29_s3, 6   ;;  %s1510_s11 = sld [smem:[#allocation15_spill]] }
 0x182   : > { %s1511_s12 = sld [smem:[#allocation16_spill]]  ;;  %s1512_s13 = sld [smem:[#allocation17_spill]] }
 0x183   : > { %s1513_s29 = smov %s1099_s30  ;;  %s1514_s30 = smov %s1103_s9 }
 0x184   : > { %s1515_s9 = smov %s1253_s24  ;;  %28 = sbr.rel (!%p26_p3) target bundleno = 14 (0xe), region = 135 }
 0x18b   :  { %633 = vsyncpa [#allocation4], 1 }
 0x18c   :  { %635 = vsyncpa [#allocation4 + $0x1], 1 }
 0x18d   :  { %636 = vsyncpa [#allocation6], 1 }
 0x18e   :  { %638 = vsyncpa [#allocation6 + $0x1], 1 }
 0x18f   :  { %639 = vsyncpa [#allocation9], 1 }
 0x190   :  { %641 = vsyncpa [#allocation9 + $0x1], 1 }

</bundles_post_ra>
